<compile_context>
chip_gen: v5e
topology: v5e:2x2
jax: 0.10.0
libtpu: 0.0.40
codegen_flags: <defaults>
</compile_context>

<pallas_src>
import functools

import jax
import jax.numpy as jnp
from jax.experimental import pallas as pl
from jax.experimental.pallas import tpu as pltpu


def _round_up(x, m):
    return ((x + m - 1) // m) * m


def _ffn_kernel_acc(x_ref, w1_ref, b1_ref, w2_ref, b2_ref, o_ref, acc_ref):
    # x_ref:  (tm, d_model_p)      compute dtype
    # w1_ref: (d_model_p, tk)      compute dtype
    # b1_ref: (1, tk)              f32
    # w2_ref: (tk, d_model_p)      compute dtype
    # b2_ref: (1, d_model_p)       f32
    # o_ref:  (tm, d_model_p)      output dtype
    # acc_ref:(tm, d_model_p)      f32 accumulator (resident across k)
    k = pl.program_id(1)

    @pl.when(k == 0)
    def _():
        acc_ref[...] = jnp.zeros_like(acc_ref)

    # First matmul on this d_ff chunk, bias + ReLU in f32.
    h = jnp.dot(x_ref[...], w1_ref[...], preferred_element_type=jnp.float32)
    h = jnp.maximum(h + b1_ref[...], 0.0)

    # dropout (eval mode) == identity

    # Second matmul: partial contribution of this d_ff chunk, accumulated f32.
    acc_ref[...] += jnp.dot(h.astype(w2_ref.dtype), w2_ref[...],
                            preferred_element_type=jnp.float32)

    @pl.when(k == pl.num_programs(1) - 1)
    def _():
        o_ref[...] = (acc_ref[...] + b2_ref[...]).astype(o_ref.dtype)


def _ffn_kernel_single(x_ref, w1_ref, b1_ref, w2_ref, b2_ref, o_ref):
    # Single d_ff chunk: no accumulator scratch, no phase gating.
    h = jnp.dot(x_ref[...], w1_ref[...], preferred_element_type=jnp.float32)
    h = jnp.maximum(h + b1_ref[...], 0.0)
    y = jnp.dot(h.astype(w2_ref.dtype), w2_ref[...],
                preferred_element_type=jnp.float32)
    o_ref[...] = (y + b2_ref[...]).astype(o_ref.dtype)


@functools.partial(jax.jit, static_argnames=("tm", "tk", "compute_dtype"))
def positionwise_feed_forward(x, w1, b1, w2, b2, *, tm=256, tk=512,
                              compute_dtype=None):
    """x: [B, S, d_model]; w1: [d_model, d_ff]; b1: [d_ff];
    w2: [d_ff, d_model]; b2: [d_model]."""
    assert tm % 8 == 0, "tm must be a multiple of 8"
    assert tk % 128 == 0, "tk must be a multiple of 128"

    B, S, d_model = x.shape
    d_ff = w1.shape[1]
    out_dtype = x.dtype
    cdt = x.dtype if compute_dtype is None else compute_dtype

    M = B * S
    # Lane-dense padded dims; clamp tiles for tiny inputs.
    dmp = _round_up(d_model, 128)
    tm_eff = min(tm, _round_up(M, 8))
    Mp = _round_up(M, tm_eff)
    tk_eff = min(tk, _round_up(d_ff, 128))
    dfp = _round_up(d_ff, tk_eff)

    # Pad-and-slice: zero padding is exact for this FFN (padded d_ff columns
    # produce relu(0 + 0) = 0 which contributes nothing; padded d_model rows of
    # W2 are multiplied by those zeros; padded output columns are sliced off).
    x2d = jnp.pad(x.reshape(M, d_model).astype(cdt),
                  ((0, Mp - M), (0, dmp - d_model)))
    w1p = jnp.pad(w1.astype(cdt), ((0, dmp - d_model), (0, dfp - d_ff)))
    b1p = jnp.pad(b1.astype(jnp.float32).reshape(1, d_ff),
                  ((0, 0), (0, dfp - d_ff)))
    w2p = jnp.pad(w2.astype(cdt), ((0, dfp - d_ff), (0, dmp - d_model)))
    b2p = jnp.pad(b2.astype(jnp.float32).reshape(1, d_model),
                  ((0, 0), (0, dmp - d_model)))

    # Explicit VMEM budget: double-buffered blocks + f32 accumulator scratch,
    # plus headroom, capped at v7x's 64 MiB physical VMEM.
    cbytes = jnp.dtype(cdt).itemsize
    obytes = jnp.dtype(out_dtype).itemsize
    vmem_needed = 2 * (
        tm_eff * dmp * cbytes        # x tile
        + dmp * tk_eff * cbytes      # W1 tile
        + 8 * tk_eff * 4             # b1 (sublane-padded)
        + tk_eff * dmp * cbytes      # W2 tile
        + 8 * dmp * 4                # b2 (sublane-padded)
        + tm_eff * dmp * obytes      # out tile
    ) + tm_eff * dmp * 4             # accumulator scratch
    vmem_limit = int(min(64 << 20, max(vmem_needed + (4 << 20), 16 << 20)))

    n_m = Mp // tm_eff
    n_k = dfp // tk_eff

    if n_k == 1:
        # Fast path: whole d_ff in one chunk -> no accumulator needed.
        out2d = pl.pallas_call(
            _ffn_kernel_single,
            out_shape=jax.ShapeDtypeStruct((Mp, dmp), out_dtype),
            grid_spec=pltpu.PrefetchScalarGridSpec(
                num_scalar_prefetch=0,
                grid=(n_m,),
                in_specs=[
                    pl.BlockSpec((tm_eff, dmp), lambda i: (i, 0)),   # x tile
                    pl.BlockSpec((dmp, tk_eff), lambda i: (0, 0)),   # W1
                    pl.BlockSpec((1, tk_eff), lambda i: (0, 0)),     # b1
                    pl.BlockSpec((tk_eff, dmp), lambda i: (0, 0)),   # W2
                    pl.BlockSpec((1, dmp), lambda i: (0, 0)),        # b2
                ],
                out_specs=pl.BlockSpec((tm_eff, dmp), lambda i: (i, 0)),
            ),
            compiler_params=pltpu.CompilerParams(
                dimension_semantics=("parallel",),
                vmem_limit_bytes=vmem_limit,
            ),
        )(x2d, w1p, b1p, w2p, b2p)
    else:
        out2d = pl.pallas_call(
            _ffn_kernel_acc,
            out_shape=jax.ShapeDtypeStruct((Mp, dmp), out_dtype),
            grid_spec=pltpu.PrefetchScalarGridSpec(
                num_scalar_prefetch=0,
                grid=(n_m, n_k),
                in_specs=[
                    pl.BlockSpec((tm_eff, dmp), lambda i, k: (i, 0)),  # x tile
                    pl.BlockSpec((dmp, tk_eff), lambda i, k: (0, k)),  # W1 chunk
                    pl.BlockSpec((1, tk_eff), lambda i, k: (0, k)),    # b1 chunk
                    pl.BlockSpec((tk_eff, dmp), lambda i, k: (k, 0)),  # W2 chunk
                    pl.BlockSpec((1, dmp), lambda i, k: (0, 0)),       # b2
                ],
                out_specs=pl.BlockSpec((tm_eff, dmp), lambda i, k: (i, 0)),
                scratch_shapes=[pltpu.VMEM((tm_eff, dmp), jnp.float32)],
            ),
            compiler_params=pltpu.CompilerParams(
                dimension_semantics=("parallel", "arbitrary"),
                vmem_limit_bytes=vmem_limit,
            ),
        )(x2d, w1p, b1p, w2p, b2p)

    return out2d[:M, :d_model].reshape(B, S, d_model)


def _init_params(key, d_model, d_ff, dtype=jnp.float32):
    """Deterministic init mirroring nn.Linear shapes.

    PyTorch stores Linear weights as [out_features, in_features]; we keep them
    pre-transposed as [in, out] so the kernel does a plain x @ W.
    """
    k1, k2, k3, k4 = jax.random.split(key, 4)
    lim1 = 1.0 / (d_model ** 0.5)
    lim2 = 1.0 / (d_ff ** 0.5)
    w1 = jax.random.uniform(k1, (d_model, d_ff), dtype, -lim1, lim1)
    b1 = jax.random.uniform(k2, (d_ff,), dtype, -lim1, lim1)
    w2 = jax.random.uniform(k3, (d_ff, d_model), dtype, -lim2, lim2)
    b2 = jax.random.uniform(k4, (d_model,), dtype, -lim2, lim2)
    return w1, b1, w2, b2


def _ref_ffn(x, w1, b1, w2, b2):
    # Pure-JAX reference (eval-mode dropout == identity).
    return jnp.maximum(x @ w1 + b1, 0.0) @ w2 + b2


if __name__ == "__main__":
    key = jax.random.PRNGKey(0)

    # --- Test 1: tiny shapes, single-chunk fast path, exact f32 match. ---
    k_x, k_p = jax.random.split(key)
    B, S, d_model, d_ff = 2, 8, 32, 64
    x = jax.random.normal(k_x, (B, S, d_model), jnp.float32)
    w1, b1, w2, b2 = _init_params(k_p, d_model, d_ff)
    ref = _ref_ffn(x, w1, b1, w2, b2)

    out = positionwise_feed_forward(x, w1, b1, w2, b2)
    out = jax.block_until_ready(out)
    assert out.shape == (B, S, d_model)
    assert jnp.allclose(out, ref, atol=1e-5, rtol=1e-5)

    # bf16 operands with f32 accumulation (recommended production config).
    out_bf16 = positionwise_feed_forward(x, w1, b1, w2, b2,
                                         compute_dtype=jnp.bfloat16)
    out_bf16 = jax.block_until_ready(out_bf16)
    assert out_bf16.shape == (B, S, d_model)
    assert jnp.allclose(out_bf16, ref, atol=1e-1, rtol=1e-1)

    # --- Test 2: exercise the multi-chunk (accumulator) path. ---
    k_x2, k_p2 = jax.random.split(jax.random.PRNGKey(1))
    B2, S2, dm2, df2 = 2, 64, 128, 512
    x2 = jax.random.normal(k_x2, (B2, S2, dm2), jnp.float32)
    w1b, b1b, w2b, b2b = _init_params(k_p2, dm2, df2)
    ref2 = _ref_ffn(x2, w1b, b1b, w2b, b2b)

    out2 = positionwise_feed_forward(x2, w1b, b1b, w2b, b2b, tk=256)
    out2 = jax.block_until_ready(out2)
    assert out2.shape == (B2, S2, dm2)
    assert jnp.allclose(out2, ref2, atol=1e-4, rtol=1e-4)

    print("KERNEL_OK")
</pallas_src>

<mosaic_0001>
module attributes {stable_mosaic.version = 11 : i64} {
  func.func @_ffn_kernel_single(%arg0: i32, %arg1: memref<16x128xf32, #tpu.memory_space<vmem>>, %arg2: memref<128x128xf32, #tpu.memory_space<vmem>>, %arg3: memref<1x128xf32, #tpu.memory_space<vmem>>, %arg4: memref<128x128xf32, #tpu.memory_space<vmem>>, %arg5: memref<1x128xf32, #tpu.memory_space<vmem>>, %arg6: memref<16x128xf32, #tpu.memory_space<vmem>>) attributes {dimension_semantics = [#tpu.dimension_semantics<parallel>], iteration_bounds = array<i64: 1>, scalar_prefetch = 0 : i64, scratch_operands = 0 : i64, tpu.core_type = #tpu.core_type<tc>, window_params = [{transform_indices = @transform_0, window_bounds = array<i64: 16, 128>}, {pipeline_mode = #tpu.pipeline_mode<synchronous>, transform_indices = @transform_1, window_bounds = array<i64: 128, 128>}, {pipeline_mode = #tpu.pipeline_mode<synchronous>, transform_indices = @transform_2, window_bounds = array<i64: 1, 128>}, {pipeline_mode = #tpu.pipeline_mode<synchronous>, transform_indices = @transform_3, window_bounds = array<i64: 128, 128>}, {pipeline_mode = #tpu.pipeline_mode<synchronous>, transform_indices = @transform_4, window_bounds = array<i64: 1, 128>}, {transform_indices = @transform_5, window_bounds = array<i64: 16, 128>}]} {
    %c0 = arith.constant 0 : index
    %c0_0 = arith.constant 0 : index
    %0 = vector.load %arg1[%c0, %c0_0] : memref<16x128xf32, #tpu.memory_space<vmem>>, vector<16x128xf32>
    %c0_1 = arith.constant 0 : index
    %c0_2 = arith.constant 0 : index
    %1 = vector.load %arg2[%c0_1, %c0_2] : memref<128x128xf32, #tpu.memory_space<vmem>>, vector<128x128xf32>
    %cst = arith.constant dense<0.000000e+00> : vector<16x128xf32>
    %2 = tpu.matmul %0, %1, %cst {dimension_numbers = #tpu.dot_dimension_numbers<[1], [0], [0], [1], [0, 0, 1, 1], [], []>} : vector<16x128xf32>, vector<128x128xf32>, vector<16x128xf32> -> vector<16x128xf32>
    %c0_3 = arith.constant 0 : index
    %c0_4 = arith.constant 0 : index
    %3 = vector.load %arg3[%c0_3, %c0_4] : memref<1x128xf32, #tpu.memory_space<vmem>>, vector<1x128xf32>
    %4 = vector.broadcast %3 : vector<1x128xf32> to vector<16x128xf32>
    %5 = arith.addf %2, %4 : vector<16x128xf32>
    %cst_5 = arith.constant 0.000000e+00 : f32
    %6 = vector.broadcast %cst_5 : f32 to vector<16x128xf32>
    %7 = arith.maximumf %5, %6 : vector<16x128xf32>
    %c0_6 = arith.constant 0 : index
    %c0_7 = arith.constant 0 : index
    %8 = vector.load %arg4[%c0_6, %c0_7] : memref<128x128xf32, #tpu.memory_space<vmem>>, vector<128x128xf32>
    %cst_8 = arith.constant dense<0.000000e+00> : vector<16x128xf32>
    %9 = tpu.matmul %7, %8, %cst_8 {dimension_numbers = #tpu.dot_dimension_numbers<[1], [0], [0], [1], [0, 0, 1, 1], [], []>} : vector<16x128xf32>, vector<128x128xf32>, vector<16x128xf32> -> vector<16x128xf32>
    %c0_9 = arith.constant 0 : index
    %c0_10 = arith.constant 0 : index
    %10 = vector.load %arg5[%c0_9, %c0_10] : memref<1x128xf32, #tpu.memory_space<vmem>>, vector<1x128xf32>
    %11 = vector.broadcast %10 : vector<1x128xf32> to vector<16x128xf32>
    %12 = arith.addf %9, %11 : vector<16x128xf32>
    %c0_11 = arith.constant 0 : index
    %c0_12 = arith.constant 0 : index
    %13 = vector.load %arg6[%c0_11, %c0_12] : memref<16x128xf32, #tpu.memory_space<vmem>>, vector<16x128xf32>
    tpu.vector_store %arg6[%c0_11, %c0_12], %12 {strides = array<i32>} : memref<16x128xf32, #tpu.memory_space<vmem>>, vector<16x128xf32>,
    return
  }
  func.func @transform_0(%arg0: i32) -> (i32, i32) {
    %c0_i32 = arith.constant 0 : i32
    %c0_i32_0 = arith.constant 0 : i32
    return %arg0, %c0_i32 : i32, i32
  }
  func.func @transform_1(%arg0: i32) -> (i32, i32) {
    %c0_i32 = arith.constant 0 : i32
    %c0_i32_0 = arith.constant 0 : i32
    %c0_i32_1 = arith.constant 0 : i32
    return %c0_i32, %c0_i32_0 : i32, i32
  }
  func.func @transform_2(%arg0: i32) -> (i32, i32) {
    %c0_i32 = arith.constant 0 : i32
    %c0_i32_0 = arith.constant 0 : i32
    %c0_i32_1 = arith.constant 0 : i32
    return %c0_i32, %c0_i32_0 : i32, i32
  }
  func.func @transform_3(%arg0: i32) -> (i32, i32) {
    %c0_i32 = arith.constant 0 : i32
    %c0_i32_0 = arith.constant 0 : i32
    %c0_i32_1 = arith.constant 0 : i32
    return %c0_i32, %c0_i32_0 : i32, i32
  }
  func.func @transform_4(%arg0: i32) -> (i32, i32) {
    %c0_i32 = arith.constant 0 : i32
    %c0_i32_0 = arith.constant 0 : i32
    %c0_i32_1 = arith.constant 0 : i32
    return %c0_i32, %c0_i32_0 : i32, i32
  }
  func.func @transform_5(%arg0: i32) -> (i32, i32) {
    %c0_i32 = arith.constant 0 : i32
    %c0_i32_0 = arith.constant 0 : i32
    return %arg0, %c0_i32 : i32, i32
  }
}

</mosaic_0001>

<bundles_post_ra>
// kernel: positionwise_feed_forward.1
= control target key start
LH: loop header
LB: loop body
LE: loop exit
PB: predicated region body
PF: predicated region fallthrough
CT: control target
= control target key end

     0   :  { %s294_s1 = inlined_call_operand.vmem [shape: f32[128,128], index: 1, kind: input, shape index: {}]   ;;  %s295_s3 = inlined_call_operand.vmem [shape: f32[128,128], index: 3, kind: input, shape index: {}]   ;;  %s296_s2 = inlined_call_operand.vmem [shape: f32[1,128], index: 2, kind: input, shape index: {}]   ;;  %s297_s0 = inlined_call_operand.vmem [shape: f32[16,128], index: 0, kind: input, shape index: {}]   ;;  %s298_s4 = inlined_call_operand.vmem [shape: f32[1,128], index: 4, kind: input, shape index: {}]   ;;  %s299_s5 = inlined_call_operand.vmem [shape: f32[16,128], index: 5, kind: output, shape index: {}]  }
   0x1   :  { %v37_v0 = vld [vmem:[%s294_s1 + $0x78] sm:$0xff]  ;;  %v36_v1 = vld [vmem:[%s294_s1 + $0x70] sm:$0xff]  ;;  %v35_v2 = vld [vmem:[%s294_s1 + $0x68] sm:$0xff] }
   0x2   :  { %116 = vmatpush.msra.mxu2 %v37_v0  ;;  %42 = vmatpush.msra.mxu0 %v37_v0  ;;  %v34_v3 = vld [vmem:[%s294_s1 + $0x60] sm:$0xff]  ;;  %v33_v4 = vld [vmem:[%s294_s1 + $0x58] sm:$0xff]  ;;  %v81_v6 = vld [vmem:[%s295_s3 + $0x70] sm:$0xff] }
   0x3   :  { %v82_v5 = vld [vmem:[%s295_s3 + $0x78] sm:$0xff]  ;;  %v32_v7 = vld [vmem:[%s294_s1 + $0x50] sm:$0xff]  ;;  %v80_v8 = vld [vmem:[%s295_s3 + $0x68] sm:$0xff] }
   0x4   :  { %117 = vmatpush.msra.mxu2 %v36_v1  ;;  %43 = vmatpush.msra.mxu0 %v36_v1  ;;  %v31_v9 = vld [vmem:[%s294_s1 + $0x48] sm:$0xff]  ;;  %v79_v10 = vld [vmem:[%s295_s3 + $0x60] sm:$0xff]  ;;  %v78_v12 = vld [vmem:[%s295_s3 + $0x58] sm:$0xff] }
   0x5   :  { %132 = vmatpush.msra.mxu3 %v82_v5  ;;  %87 = vmatpush.msra.mxu1 %v82_v5  ;;  %v30_v11 = vld [vmem:[%s294_s1 + $0x40] sm:$0xff]  ;;  %v29_v13 = vld [vmem:[%s294_s1 + $0x38] sm:$0xff]  ;;  %v77_v14 = vld [vmem:[%s295_s3 + $0x50] sm:$0xff] }
   0x6   :  { %118 = vmatpush.msra.mxu2 %v35_v2  ;;  %44 = vmatpush.msra.mxu0 %v35_v2  ;;  %v28_v15 = vld [vmem:[%s294_s1 + $0x30] sm:$0xff]  ;;  %v76_v16 = vld [vmem:[%s295_s3 + $0x48] sm:$0xff]  ;;  %v75_v18 = vld [vmem:[%s295_s3 + $0x40] sm:$0xff] }
   0x7   :  { %133 = vmatpush.msra.mxu3 %v81_v6  ;;  %88 = vmatpush.msra.mxu1 %v81_v6  ;;  %v27_v17 = vld [vmem:[%s294_s1 + $0x28] sm:$0xff]  ;;  %v26_v19 = vld [vmem:[%s294_s1 + $0x20] sm:$0xff]  ;;  %v74_v20 = vld [vmem:[%s295_s3 + $0x38] sm:$0xff] }
   0x8   :  { %119 = vmatpush.msra.mxu2 %v34_v3  ;;  %45 = vmatpush.msra.mxu0 %v34_v3  ;;  %v25_v21 = vld [vmem:[%s294_s1 + $0x18] sm:$0xff]  ;;  %v73_v22 = vld [vmem:[%s295_s3 + $0x30] sm:$0xff]  ;;  %v72_v24 = vld [vmem:[%s295_s3 + $0x28] sm:$0xff] }
   0x9   :  { %134 = vmatpush.msra.mxu3 %v80_v8  ;;  %89 = vmatpush.msra.mxu1 %v80_v8  ;;  %v24_v23 = vld [vmem:[%s294_s1 + $0x10] sm:$0xff]  ;;  %v23_v25 = vld [vmem:[%s294_s1 + $0x8] sm:$0xff]  ;;  %v71_v26 = vld [vmem:[%s295_s3 + $0x20] sm:$0xff] }
   0xa   :  { %120 = vmatpush.msra.mxu2 %v33_v4  ;;  %46 = vmatpush.msra.mxu0 %v33_v4  ;;  %v22_v27 = vld [vmem:[%s294_s1] sm:$0xff]  ;;  %v21_v28 = vld [vmem:[%s297_s0 + $0x8] sm:$0xff]  ;;  %v70_v30 = vld [vmem:[%s295_s3 + $0x18] sm:$0xff] }
   0xb   :  { %135 = vmatpush.msra.mxu3 %v79_v10  ;;  %90 = vmatpush.msra.mxu1 %v79_v10  ;;  %v20_v29 = vld [vmem:[%s297_s0] sm:$0xff]  ;;  %v69_v31 = vld [vmem:[%s295_s3 + $0x10] sm:$0xff]  ;;  %v68_v32 = vld [vmem:[%s295_s3 + $0x8] sm:$0xff] }
   0xc   :  { %121 = vmatpush.msra.mxu2 %v32_v7  ;;  %47 = vmatpush.msra.mxu0 %v32_v7  ;;  %v67_v33 = vld [vmem:[%s295_s3] sm:$0xff] }
   0xd   :  { %136 = vmatpush.msra.mxu3 %v78_v12  ;;  %91 = vmatpush.msra.mxu1 %v78_v12  ;;  %v148_v34 = vld [vmem:[%s296_s2] ss:$0 sm:$0xff] }
   0xe   :  { %122 = vmatpush.msra.mxu2 %v31_v9  ;;  %48 = vmatpush.msra.mxu0 %v31_v9  ;;  %v149_v41 = vld [vmem:[%s298_s4] ss:$0 sm:$0xff] }
   0xf   :  { %137 = vmatpush.msra.mxu3 %v77_v14  ;;  %92 = vmatpush.msra.mxu1 %v77_v14 }
  0x10   :  { %123 = vmatpush.msra.mxu2 %v30_v11  ;;  %49 = vmatpush.msra.mxu0 %v30_v11 }
  0x11   :  { %138 = vmatpush.msra.mxu3 %v76_v16  ;;  %93 = vmatpush.msra.mxu1 %v76_v16 }
  0x12   :  { %124 = vmatpush.msra.mxu2 %v29_v13  ;;  %50 = vmatpush.msra.mxu0 %v29_v13 }
  0x13   :  { %139 = vmatpush.msra.mxu3 %v75_v18  ;;  %94 = vmatpush.msra.mxu1 %v75_v18 }
  0x14   :  { %125 = vmatpush.msra.mxu2 %v28_v15  ;;  %51 = vmatpush.msra.mxu0 %v28_v15 }
  0x15   :  { %140 = vmatpush.msra.mxu3 %v74_v20  ;;  %95 = vmatpush.msra.mxu1 %v74_v20 }
  0x16   :  { %126 = vmatpush.msra.mxu2 %v27_v17  ;;  %52 = vmatpush.msra.mxu0 %v27_v17 }
  0x17   :  { %141 = vmatpush.msra.mxu3 %v73_v22  ;;  %96 = vmatpush.msra.mxu1 %v73_v22 }
  0x18   :  { %127 = vmatpush.msra.mxu2 %v26_v19  ;;  %53 = vmatpush.msra.mxu0 %v26_v19 }
  0x19   :  { %142 = vmatpush.msra.mxu3 %v72_v24  ;;  %97 = vmatpush.msra.mxu1 %v72_v24 }
  0x1a   :  { %128 = vmatpush.msra.mxu2 %v25_v21  ;;  %54 = vmatpush.msra.mxu0 %v25_v21 }
  0x1b   :  { %143 = vmatpush.msra.mxu3 %v71_v26  ;;  %98 = vmatpush.msra.mxu1 %v71_v26 }
  0x1c   :  { %129 = vmatpush.msra.mxu2 %v24_v23  ;;  %55 = vmatpush.msra.mxu0 %v24_v23 }
  0x1d   :  { %144 = vmatpush.msra.mxu3 %v70_v30  ;;  %99 = vmatpush.msra.mxu1 %v70_v30 }
  0x1e   :  { %130 = vmatpush.msra.mxu2 %v23_v25  ;;  %56 = vmatpush.msra.mxu0 %v23_v25 }
  0x1f   :  { %145 = vmatpush.msra.mxu3 %v69_v31  ;;  %100 = vmatpush.msra.mxu1 %v69_v31 }
  0x20   :  { %131 = vmatpush.msra.mxu2 %v22_v27  ;;  %57 = vmatpush.msra.mxu0 %v22_v27 }
  0x21   :  { %61 = vmatmul.f32.vlgmr.msra.gmra.mxu2 %v21_v28  ;;  %58 = vmatmul.f32.vlgmr.msra.gmra.mxu0 %v20_v29 }
  0x22   :  { %146 = vmatpush.msra.mxu3 %v68_v32  ;;  %101 = vmatpush.msra.mxu1 %v68_v32 }
  0x24   :  { %147 = vmatpush.msra.mxu3 %v67_v33  ;;  %102 = vmatpush.msra.mxu1 %v67_v33 }
  0x9e   :  { %v59_v35 = vpop.f32.mrf.mxu0 }
  0x9f   :  { %v60_v36 = vadd.f32 %v148_v34, %v59_v35 }
  0xa1   :  { %v65_v37 = vmax.f32 %v60_v36, 0.0 }
  0xa3   :  { %103 = vmatmul.f32.vlgmr.msra.gmra.mxu1 %v65_v37 }
  0xa4   :  { %v62_v38 = vpop.f32.mrf.mxu2 }
  0xa5   :  { %v63_v39 = vadd.f32 %v148_v34, %v62_v38 }
  0xa7   :  { %v66_v40 = vmax.f32 %v63_v39, 0.0 }
  0xa9   :  { %106 = vmatmul.f32.vlgmr.msra.gmra.mxu3 %v66_v40 }
 0x120   :  { %v104_v42 = vpop.f32.mrf.mxu1 }
 0x121   :  { %v105_v43 = vadd.f32 %v149_v41, %v104_v42 }
 0x123   :  { %110 = vst [vmem:[%s299_s5] sm:$0xff] %v105_v43 }
 0x12c   :  { %v107_v44 = vpop.f32.mrf.mxu3 }
 0x12d   :  { %v108_v45 = vadd.f32 %v149_v41, %v107_v44 }
 0x12f   :  { %111 = vst [vmem:[%s299_s5 + $0x8] sm:$0xff] %v108_v45 }

</bundles_post_ra>
